<compile_context>
chip_gen: v7x
topology: tpu7x:2x2x1
jax: 0.10.0
libtpu: 0.0.40
codegen_flags: <defaults>
</compile_context>

<pallas_src>
import functools

import jax
import jax.numpy as jnp
import numpy as np
from jax.experimental import pallas as pl
from jax.experimental.pallas import tpu as pltpu


# ---------------------------------------------------------------------------
# "Module init": build the sinusoidal positional-encoding table (no params).
# ---------------------------------------------------------------------------
def make_positional_table(max_len: int, embed_dim: int, dtype=jnp.float32):
    assert embed_dim % 2 == 0
    pos = jnp.arange(max_len, dtype=jnp.float32)[:, None]                     # (L, 1)
    freqs = 10000.0 ** (jnp.arange(embed_dim // 2, dtype=jnp.float32)
                        * (-2.0 / embed_dim))                                 # (D/2,)
    outer = pos * freqs                                                       # (L, D/2)
    pe = jnp.zeros((max_len, embed_dim), jnp.float32)
    pe = pe.at[:, 0::2].set(jnp.sin(outer))
    pe = pe.at[:, 1::2].set(jnp.cos(outer))
    return pe.astype(dtype)                                                   # (L, D)


# ---------------------------------------------------------------------------
# Pallas kernels: one lane-dense (N, c_block) tile per grid step.
# ---------------------------------------------------------------------------
def _pe_add_kernel(x_ref, pe_ref, o_ref):
    # x_ref/o_ref: (N, c_block); pe_ref: (1, c_block) -> broadcast over sublanes.
    o_ref[...] = (x_ref[...] + pe_ref[...]).astype(o_ref.dtype)


def _pe_add_dropout_kernel(x_ref, pe_ref, bits_ref, o_ref, *, threshold, scale):
    val = x_ref[...] + pe_ref[...]
    # Integer threshold compare: keep with probability (1 - p).
    keep = bits_ref[...] >= jnp.uint32(threshold)
    o_ref[...] = jnp.where(keep, val * scale, 0.0).astype(o_ref.dtype)


# ---------------------------------------------------------------------------
# Wrapper
# ---------------------------------------------------------------------------
def _target_block_bytes() -> int:
    """Per-block byte budget, generation-aware (v7x has 64 MiB VMEM)."""
    vmem_bytes = 128 << 20  # v5e / v6e physical VMEM; safe fallback off-TPU.
    try:
        vmem_bytes = int(pltpu.get_tpu_info().vmem_capacity_bytes)
    except Exception:
        pass
    # x + out (+ bits) blocks, each double-buffered, plus the pe slice must fit
    # comfortably under the scoped limit; ~2 MiB/block is the mem-bound sweet spot.
    return int(min(2 << 20, vmem_bytes // 48))


def positional_encoding_forward(x, pe_table, *, dropout_p=0.1, train=False,
                                rng_key=None):
    """x: (N, S, D); pe_table: (max_len, D). Returns dropout(x + pe[:S])."""
    N, S, D = x.shape
    C = S * D
    assert 0.0 <= dropout_p < 1.0

    # Lane-dense flattened views; pe cast hoisted out of the kernel.
    x2 = x.reshape(N, C)
    pe2 = pe_table[:S, :].astype(x.dtype).reshape(1, C)

    use_dropout = bool(train) and dropout_p > 0.0
    if use_dropout:
        if rng_key is None:
            rng_key = jax.random.PRNGKey(0)
        bits = jax.random.bits(rng_key, (N, C), dtype=jnp.uint32)

    # ---- lane-dense tile selection ---------------------------------------
    itemsize = jnp.dtype(x.dtype).itemsize
    bytes_per_elem = 2 * itemsize + (4 if use_dropout else 0)   # x + out (+ bits)
    target = _target_block_bytes()
    c_block = (target // max(1, N * bytes_per_elem)) // 128 * 128
    c_block = max(128, c_block)
    if c_block >= C:
        c_block = C          # full row; also handles C not a multiple of 128
    grid = (pl.cdiv(C, c_block),)
    # NOTE: for very large N one would add a second (row-tiled) grid axis; the
    # batch dim here rides along inside each block.

    x_spec = pl.BlockSpec((N, c_block), lambda j: (0, j))
    pe_spec = pl.BlockSpec((1, c_block), lambda j: (0, j))
    out_spec = pl.BlockSpec((N, c_block), lambda j: (0, j))

    flops = N * C * (3 if use_dropout else 1)
    bytes_accessed = (2 * N * C * itemsize + C * itemsize
                      + (4 * N * C if use_dropout else 0))
    cost = pl.CostEstimate(flops=flops, transcendentals=0,
                           bytes_accessed=bytes_accessed)
    cparams = pltpu.CompilerParams(dimension_semantics=("parallel",))

    if use_dropout:
        threshold = np.uint32(min(round(dropout_p * float(1 << 32)),
                                  (1 << 32) - 1))
        scale = 1.0 / (1.0 - dropout_p)
        kernel = functools.partial(_pe_add_dropout_kernel,
                                   threshold=threshold, scale=scale)
        out2 = pl.pallas_call(
            kernel,
            out_shape=jax.ShapeDtypeStruct((N, C), x.dtype),
            grid=grid,
            in_specs=[x_spec, pe_spec,
                      pl.BlockSpec((N, c_block), lambda j: (0, j))],
            out_specs=out_spec,
            compiler_params=cparams,
            cost_estimate=cost,
        )(x2, pe2, bits)
    else:
        out2 = pl.pallas_call(
            _pe_add_kernel,
            out_shape=jax.ShapeDtypeStruct((N, C), x.dtype),
            grid=grid,
            in_specs=[x_spec, pe_spec],
            out_specs=out_spec,
            compiler_params=cparams,
            cost_estimate=cost,
        )(x2, pe2)

    return out2.reshape(N, S, D)


# ---------------------------------------------------------------------------
# Demo / self-check
# ---------------------------------------------------------------------------
if __name__ == "__main__":
    N, S, D = 2, 8, 32
    MAX_LEN = 5000
    DROPOUT_P = 0.1

    root = jax.random.PRNGKey(0)
    kx, kdrop = jax.random.split(root)
    x = jax.random.normal(kx, (N, S, D), dtype=jnp.float32)

    pe_table = make_positional_table(MAX_LEN, D, dtype=jnp.float32)
    ref_add = x + pe_table[None, :S, :]

    # Eval mode (dropout = identity): must match x + pe.
    out_eval = positional_encoding_forward(x, pe_table, dropout_p=DROPOUT_P,
                                           train=False)
    out_eval = jax.block_until_ready(out_eval)
    assert out_eval.shape == (N, S, D)
    assert jnp.allclose(out_eval, ref_add, atol=1e-5, rtol=1e-5)

    # Train mode: inverted dropout with a known bit-stream -> exact reference.
    out_train = positional_encoding_forward(x, pe_table, dropout_p=DROPOUT_P,
                                            train=True, rng_key=kdrop)
    out_train = jax.block_until_ready(out_train)
    assert out_train.shape == (N, S, D)
    bits_ref = jax.random.bits(kdrop, (N, S * D), dtype=jnp.uint32).reshape(N, S, D)
    threshold = np.uint32(min(round(DROPOUT_P * float(1 << 32)), (1 << 32) - 1))
    keep = bits_ref >= threshold
    ref_train = jnp.where(keep, ref_add / (1.0 - DROPOUT_P), 0.0)
    assert jnp.allclose(out_train, ref_train, atol=1e-5, rtol=1e-5)

    print("KERNEL_OK")
</pallas_src>

<mosaic_0001>
module attributes {stable_mosaic.version = 11 : i64} {
  func.func @_pe_add_kernel(%arg0: i32, %arg1: memref<2x256xf32, #tpu.memory_space<vmem>>, %arg2: memref<1x256xf32, #tpu.memory_space<vmem>>, %arg3: memref<2x256xf32, #tpu.memory_space<vmem>>) attributes {dimension_semantics = [#tpu.dimension_semantics<parallel>], iteration_bounds = array<i64: 1>, scalar_prefetch = 0 : i64, scratch_operands = 0 : i64, tpu.core_type = #tpu.core_type<tc>, window_params = [{transform_indices = @transform_0, window_bounds = array<i64: 2, 256>}, {transform_indices = @transform_1, window_bounds = array<i64: 1, 256>}, {transform_indices = @transform_2, window_bounds = array<i64: 2, 256>}]} {
    %c0 = arith.constant 0 : index
    %c0_0 = arith.constant 0 : index
    %0 = vector.load %arg1[%c0, %c0_0] : memref<2x256xf32, #tpu.memory_space<vmem>>, vector<2x256xf32>
    %c0_1 = arith.constant 0 : index
    %c0_2 = arith.constant 0 : index
    %1 = vector.load %arg2[%c0_1, %c0_2] : memref<1x256xf32, #tpu.memory_space<vmem>>, vector<1x256xf32>
    %2 = vector.broadcast %1 : vector<1x256xf32> to vector<2x256xf32>
    %3 = arith.addf %0, %2 : vector<2x256xf32>
    %c0_3 = arith.constant 0 : index
    %c0_4 = arith.constant 0 : index
    %4 = vector.load %arg3[%c0_3, %c0_4] : memref<2x256xf32, #tpu.memory_space<vmem>>, vector<2x256xf32>
    tpu.vector_store %arg3[%c0_3, %c0_4], %3 {strides = array<i32>} : memref<2x256xf32, #tpu.memory_space<vmem>>, vector<2x256xf32>,
    return
  }
  func.func @transform_0(%arg0: i32) -> (i32, i32) {
    %c0_i32 = arith.constant 0 : i32
    %c0_i32_0 = arith.constant 0 : i32
    return %c0_i32, %arg0 : i32, i32
  }
  func.func @transform_1(%arg0: i32) -> (i32, i32) {
    %c0_i32 = arith.constant 0 : i32
    %c0_i32_0 = arith.constant 0 : i32
    return %c0_i32, %arg0 : i32, i32
  }
  func.func @transform_2(%arg0: i32) -> (i32, i32) {
    %c0_i32 = arith.constant 0 : i32
    %c0_i32_0 = arith.constant 0 : i32
    return %c0_i32, %arg0 : i32, i32
  }
}

</mosaic_0001>

<bundles_post_ra>
// kernel: tpu_custom_call.1
= control target key start
LH: loop header
LB: loop body
LE: loop exit
PB: predicated region body
PF: predicated region fallthrough
CT: control target
= control target key end

     0   :  { %7 = vsyncpa [#allocation3], 0  ;;  %s157_s0 = inlined_call_operand.hbm [shape: f32[2,256], index: 0, kind: input, shape index: {}]   ;;  %s158_s1 = inlined_call_operand.vmem [shape: f32[1,256], index: 1, kind: input, shape index: {}]   ;;  %s159_s2 = inlined_call_operand.hbm [shape: f32[2,256], index: 2, kind: output, shape index: {}]  }
   0x1   :  { %8 = vsyncpa [#allocation4], 0  ;;  %s112_s9 = smov [#allocation2]   ;;  %s64_s13 = scalar_lea.hbm %s157_s0, 64 }
   0x2   :  { %s15_s10 = sshll.u32 %s112_s9, 4  ;;  %p65_p0 = scmp.ne.s32.totalorder %s157_s0, %s64_s13  ;;  %s16_s10 = int_to_ptr.vmem [resolvable:$true] %s15_s10 }
   0x3   :  { %p68_p1 = scmp.lt.u32.totalorder %s64_s13, %s157_s0 }
   0x5   :  { %p70_p2 = pnand %p68_p1, %p65_p0 }
   0x7   :  { %73 = shalt.err (!%p70_p2)
}
   0x8   :  { %s74_s18 = scalar_lea.vmem %s16_s10, 64  ;;  %p79_p4 = scmp.lt.s32.totalorder %s16_s10, %s16_s10 }
   0x9   :  { %p75_p3 = scmp.ne.s32.totalorder %s16_s10, %s74_s18  ;;  %p80_p5 = scmp.lt.s32.totalorder %s74_s18, %s74_s18 }
   0xb   :  { %p81_p6 = por %p80_p5, %p79_p4 }
   0xd   :  { %p82_p7 = pnand %p81_p6, %p75_p3 }
   0xf   :  { %85 = shalt.err (!%p82_p7)
}
  0x10   :  { %18 = dma.hbm_to_vmem [thread:$0]  %s157_s0, 64, %s16_s10, [#allocation3]  }
  0x11   :  { %108 = dma.done.wait [#allocation3], 64  }
  0x12   :  { %109 = vsyncadd [#allocation3], 4294967232  ;;  %v27_v0 = vlaneseq  ;;  %v113_v1 = vmov 1983009808   ;;  %v25_v7 = vld [vmem:[%s158_s1] sm:$0x3] }
  0x13   :  { %v37_v2 = vunpack.c.l.s4 %v113_v1  ;;  %v24_v12 = vld [vmem:[#allocation2] sm:$0xf]  ;;  %s114_s23 = smov [#allocation5]  }
  0x14   :  { %v28_v3 = vshrl.u32 %v27_v0, 7  ;;  %s52_s0 = sshll.u32 %s114_s23, 4  ;;  %s53_s0 = int_to_ptr.vmem [resolvable:$true] %s52_s0 }
  0x15   :  { %v38_v6 = vunpack.c.0.s8 %v37_v2  ;;  %s86_s24 = scalar_lea.vmem %s53_s0, 64  ;;  %p91_p9 = scmp.lt.s32.totalorder %s53_s0, %s53_s0 }
  0x16   :  { %v29_v4 = vsub.s32 0, %v28_v3  ;;  %v33_v5 = vsub.s32 1, %v28_v3  ;;  %p87_p8 = scmp.ne.s32.totalorder %s53_s0, %s86_s24  ;;  %p92_p10 = scmp.lt.s32.totalorder %s86_s24, %s86_s24 }
  0x17   :  { %v41_v10 = vsub.s32 %v38_v6, %v28_v3 }
  0x18   :  { %v30_v8 = vrot.slane %v25_v7, %v29_v4  ;;  %v34_v9 = vrot.slane %v25_v7, %v33_v5  ;;  %p93_p11 = por %p92_p10, %p91_p9 }
  0x1a   :  { %v35_v11 = vcombine.low %v30_v8, %v34_v9  ;;  %p94_p12 = pnand %p93_p11, %p87_p8 }
  0x1c   :  { %v42_v13 = vrot.slane %v35_v11, %v41_v10 }
  0x1e   :  { %v44_v14 = vadd.f32 %v42_v13, %v24_v12 }
  0x20   :  { %45 = vst [vmem:[#allocation5] sm:$0xf] %v44_v14 }
  0x21   :  { %97 = shalt.err (!%p94_p12)
}
  0x22   :  { %s98_s26 = scalar_lea.hbm %s159_s2, 64 }
  0x23   :  { %p99_p13 = scmp.ne.s32.totalorder %s159_s2, %s98_s26  ;;  %p102_p0 = scmp.lt.u32.totalorder %s98_s26, %s159_s2 }
  0x25   :  { %p104_p1 = pnand %p102_p0, %p99_p13 }
  0x27   :  { %107 = shalt.err (!%p104_p1)
}
  0x28   :  { %55 = dma.vmem_to_hbm [thread:$0]  %s53_s0, 64, %s159_s2, [#allocation4]  }
  0x29   :  { %110 = dma.done.wait [#allocation4], 64  }
  0x2a   :  { %111 = vsyncadd [#allocation4], 4294967232 }
  0x2b   :  { %59 = vsyncpa [#allocation3], 1 }
  0x2c   :  { %60 = vsyncpa [#allocation4], 1 }

</bundles_post_ra>
